<compile_context>
chip_gen: v5e
topology: v5e:2x2
jax: 0.10.0
libtpu: 0.0.40
codegen_flags: <defaults>
</compile_context>

<pallas_src>
import jax
import jax.numpy as jnp
from jax.experimental import pallas as pl
from jax.experimental.pallas import tpu as pltpu

LANE = 128
BLOCK_BYTES = 4 << 20          # per-buffer streaming block target (4 MiB)
STREAM_VMEM_LIMIT = 48 << 20   # safe on v7x (64 MiB phys) and v5e/v6e (128 MiB)


def _round_up(a, m):
    return ((a + m - 1) // m) * m


def _vmem_capacity_bytes():
    try:
        return int(pltpu.get_tpu_info().vmem_capacity_bytes)
    except Exception:
        return 64 << 20        # conservative (v7x per-core VMEM)


def _quant_params(scale_11, half_level, isint):
    """scale_11: (1,1) f32 = max|x|.  Returns (quant_scale, dequant|None), (1,1) f32.

    quant_scale = 2**floor(log2(half_level/scale)) computed exactly by keeping
    only the sign+exponent bits of the f32 ratio (largest power of two <= r).
    """
    safe = jnp.where(scale_11 > 0.0, scale_11, jnp.float32(1.0))
    ratio = jnp.float32(half_level) / safe
    bits = pltpu.bitcast(ratio, jnp.int32)
    quant_scale = pltpu.bitcast(bits & jnp.int32(-0x800000), jnp.float32)
    dequant = safe * jnp.float32(1.0 / half_level) if isint == 0 else None
    return quant_scale, dequant


def _make_fused_kernel(half_level, isint):
    """Single-pass kernel: whole tensor resident in VMEM, max + quantize fused."""
    def kernel(x_ref, o_ref):
        xf = x_ref[...].astype(jnp.float32)
        scale_11 = jnp.max(jnp.abs(xf), keepdims=True)          # (1, 1)
        quant_scale, dequant = _quant_params(scale_11, half_level, isint)
        y = jnp.floor(xf * quant_scale)
        if dequant is not None:
            y = y * dequant
        o_ref[...] = y.astype(o_ref.dtype)
    return kernel


def _make_stream_kernel(half_level, isint):
    """Streaming kernel: raw scale in SMEM, scalar epilogue fused per grid step."""
    def kernel(scale_ref, x_ref, o_ref):
        scale_11 = jnp.full((1, 1), scale_ref[0], jnp.float32)   # splat to VPU
        quant_scale, dequant = _quant_params(scale_11, half_level, isint)
        y = jnp.floor(x_ref[...].astype(jnp.float32) * quant_scale)
        if dequant is not None:
            y = y * dequant
        o_ref[...] = y.astype(o_ref.dtype)
    return kernel


def _xla_fallback(x, half_level, isint):
    # Rare fallback (element count not a multiple of 128): memory-bound anyway.
    xf = x.astype(jnp.float32)
    scale = jnp.max(jnp.abs(xf))
    safe = jnp.where(scale > 0.0, scale, jnp.float32(1.0))
    quant_scale = jnp.exp2(jnp.floor(jnp.log2(jnp.float32(half_level) / safe)))
    y = jnp.floor(xf * quant_scale)
    if isint == 0:
        y = y * (safe / jnp.float32(half_level))
    return y.astype(x.dtype)


def layer_quant_noise_forward(x, *, bit_level=4, isint=0, _force_streaming=False):
    half_level = 2.0 ** bit_level / 2.0 - 1.0
    if half_level <= 0:
        return x

    orig_shape = x.shape
    orig_dtype = x.dtype
    n = x.size
    if n == 0:
        return x
    if n % LANE != 0:
        return _xla_fallback(x, half_level, isint).reshape(orig_shape)

    rows = n // LANE
    x2d = x.reshape(rows, LANE)
    itemsize = x.dtype.itemsize
    slab_bytes = rows * LANE * itemsize

    vmem_cap = _vmem_capacity_bytes()
    budget = min(vmem_cap - (16 << 20), 96 << 20)
    # in-buffer + out-buffer + ~2 full-size f32 temporaries + margin
    fast_est = 2 * slab_bytes + 2 * (4 * n) + (2 << 20)

    if (not _force_streaming) and fast_est <= budget:
        # ---- Single-pass, VMEM-resident path: one launch, 2N HBM traffic ----
        vmem_limit = None if fast_est <= (12 << 20) else int(fast_est + (8 << 20))
        y2d = pl.pallas_call(
            _make_fused_kernel(half_level, isint),
            out_shape=jax.ShapeDtypeStruct((rows, LANE), orig_dtype),
            input_output_aliases={0: 0},
            compiler_params=pltpu.CompilerParams(vmem_limit_bytes=vmem_limit),
        )(x2d)
        return y2d.reshape(orig_shape)

    # ---- Two-pass streaming path for large tensors ---------------------------
    # Pass 1: global max|x| via XLA's fused reduction (HBM roofline, megacore).
    scale = jnp.max(jnp.abs(x2d)).astype(jnp.float32).reshape(1)

    # Pass 2: streaming quantization; all scalar math happens inside the kernel.
    max_block_rows = max(8, BLOCK_BYTES // (LANE * itemsize))
    if rows <= 512:
        block_rows = rows
    else:
        # >= 4 (even when possible) grid steps so "parallel" sharding keeps both
        # v7x TensorCores busy; blocks stay multiples of 8 sublanes.
        block_rows = min(max_block_rows, _round_up(pl.cdiv(rows, 4), 8))
    grid = (pl.cdiv(rows, block_rows),)

    y2d = pl.pallas_call(
        _make_stream_kernel(half_level, isint),
        out_shape=jax.ShapeDtypeStruct((rows, LANE), orig_dtype),
        grid=grid,
        in_specs=[
            pl.BlockSpec(memory_space=pltpu.MemorySpace.SMEM),   # (1,) raw scale
            pl.BlockSpec((block_rows, LANE), lambda i: (i, 0)),
        ],
        out_specs=pl.BlockSpec((block_rows, LANE), lambda i: (i, 0)),
        input_output_aliases={1: 0},
        compiler_params=pltpu.CompilerParams(
            dimension_semantics=("parallel",),
            vmem_limit_bytes=STREAM_VMEM_LIMIT),
    )(scale, x2d)
    return y2d.reshape(orig_shape)


def _reference(x, *, bit_level=4, isint=0):
    half_level = 2.0 ** bit_level / 2.0 - 1.0
    if half_level <= 0:
        return x
    xf = x.astype(jnp.float32)
    scale = jnp.max(jnp.abs(xf))
    safe = jnp.where(scale > 0.0, scale, 1.0)
    quant_scale = jnp.exp2(jnp.floor(jnp.log2(half_level / safe)))
    y = jnp.floor(xf * quant_scale)
    if isint == 0:
        y = y * safe / half_level
    y = jnp.where(scale == 0.0, xf, y)
    return y.astype(x.dtype)


if __name__ == "__main__":
    key = jax.random.PRNGKey(0)
    # NCHW activation, as the PyTorch module would receive.
    x = jax.random.normal(key, (2, 4, 16, 16), dtype=jnp.float32)

    for isint in (0, 1):
        y = layer_quant_noise_forward(x, bit_level=4, isint=isint)
        jax.block_until_ready(y)
        y_ref = _reference(x, bit_level=4, isint=isint)
        assert y.shape == x.shape and y.dtype == x.dtype
        assert jnp.allclose(y, y_ref, atol=1e-5, rtol=1e-5)

    # Streaming (two-pass) path coverage: multi-step grid + partial last block.
    x_big = jax.random.normal(jax.random.PRNGKey(1), (4, 625, 128), dtype=jnp.float32)
    y_big = layer_quant_noise_forward(x_big, bit_level=4, isint=0, _force_streaming=True)
    jax.block_until_ready(y_big)
    assert jnp.allclose(y_big, _reference(x_big, bit_level=4, isint=0),
                        atol=1e-5, rtol=1e-5)

    # Streaming kernel on the small activation too (grid == 1 corner).
    y_s = layer_quant_noise_forward(x, bit_level=4, isint=0, _force_streaming=True)
    jax.block_until_ready(y_s)
    assert jnp.allclose(y_s, _reference(x, bit_level=4, isint=0), atol=1e-5, rtol=1e-5)

    # bf16 path: dtype preserved in HBM, f32 math in-vreg.
    xb = x.astype(jnp.bfloat16)
    yb = layer_quant_noise_forward(xb, bit_level=4, isint=0)
    jax.block_until_ready(yb)
    yb_ref = _reference(xb, bit_level=4, isint=0)
    assert yb.shape == xb.shape and yb.dtype == xb.dtype
    assert jnp.allclose(yb.astype(jnp.float32), yb_ref.astype(jnp.float32),
                        atol=1e-2, rtol=1e-2)

    print("KERNEL_OK")
</pallas_src>

<mosaic_0001>
module attributes {stable_mosaic.version = 11 : i64} {
  func.func @kernel(%arg0: memref<16x128xf32, #tpu.memory_space<vmem>>, %arg1: memref<16x128xf32, #tpu.memory_space<vmem>>) attributes {dimension_semantics = [], scalar_prefetch = 0 : i64, scratch_operands = 0 : i64, tpu.core_type = #tpu.core_type<tc>} {
    %c0 = arith.constant 0 : index
    %c0_0 = arith.constant 0 : index
    %0 = vector.load %arg0[%c0, %c0_0] : memref<16x128xf32, #tpu.memory_space<vmem>>, vector<16x128xf32>
    %1 = math.absf %0 : vector<16x128xf32>
    %2 = vector.shape_cast %1 : vector<16x128xf32> to vector<1x16x128xf32>
    %cst = arith.constant dense<0xFF800000> : vector<1xf32>
    %3 = vector.multi_reduction <maximumf>, %2, %cst [1, 2] : vector<1x16x128xf32> to vector<1xf32>
    %4 = vector.shape_cast %3 : vector<1xf32> to vector<1x1x1xf32>
    %5 = vector.extract %4[0, 0, 0] : f32 from vector<1x1x1xf32>
    %6 = vector.broadcast %5 : f32 to vector<1x1xf32>
    %cst_1 = arith.constant 0.000000e+00 : f32
    %7 = vector.broadcast %cst_1 : f32 to vector<1x1xf32>
    %8 = arith.cmpf ogt, %6, %7 : vector<1x1xf32>
    %cst_2 = arith.constant 1.000000e+00 : f32
    %9 = vector.broadcast %cst_2 : f32 to vector<1x1xf32>
    %10 = arith.select %8, %6, %9 : vector<1x1xi1>, vector<1x1xf32>
    %cst_3 = arith.constant 7.000000e+00 : f32
    %11 = vector.broadcast %cst_3 : f32 to vector<1x1xf32>
    %12 = arith.divf %11, %10 : vector<1x1xf32>
    %13 = tpu.bitcast %12 : vector<1x1xf32> -> vector<1x1xi32>
    %c-8388608_i32 = arith.constant -8388608 : i32
    %14 = vector.broadcast %c-8388608_i32 : i32 to vector<1x1xi32>
    %15 = arith.andi %13, %14 : vector<1x1xi32>
    %16 = tpu.bitcast %15 : vector<1x1xi32> -> vector<1x1xf32>
    %cst_4 = arith.constant 0.142857149 : f32
    %17 = vector.broadcast %cst_4 : f32 to vector<1x1xf32>
    %18 = arith.mulf %10, %17 : vector<1x1xf32>
    %19 = vector.broadcast %16 : vector<1x1xf32> to vector<16x128xf32>
    %20 = arith.mulf %0, %19 : vector<16x128xf32>
    %21 = math.floor %20 : vector<16x128xf32>
    %22 = vector.broadcast %18 : vector<1x1xf32> to vector<16x128xf32>
    %23 = arith.mulf %21, %22 : vector<16x128xf32>
    %c0_5 = arith.constant 0 : index
    %c0_6 = arith.constant 0 : index
    %24 = vector.load %arg1[%c0_5, %c0_6] : memref<16x128xf32, #tpu.memory_space<vmem>>, vector<16x128xf32>
    tpu.vector_store %arg1[%c0_5, %c0_6], %23 {strides = array<i32>} : memref<16x128xf32, #tpu.memory_space<vmem>>, vector<16x128xf32>,
    return
  }
}

</mosaic_0001>

<bundles_post_ra>
// kernel: tpu_custom_call.1
= control target key start
LH: loop header
LB: loop body
LE: loop exit
PB: predicated region body
PF: predicated region fallthrough
CT: control target
= control target key end

     0   :  { %6 = vsyncpa [#allocation3], 0  ;;  %s174_s0 = inlined_call_operand.hbm [shape: f32[16,128], index: 0, kind: input, shape index: {}, may-alias: {0,1}]   ;;  %s175_s1 = inlined_call_operand.hbm [shape: f32[16,128], index: 1, kind: output, shape index: {}, may-alias: {0,1}]  }
   0x1   :  { %7 = vsyncpa [#allocation4], 0  ;;  %s12_s8 = sshll.u32 %s174_s0, 4  ;;  %s148_s9 = smov [#allocation2]   ;;  %s13_s8 = int_to_ptr.hbm [resolvable:$true] %s12_s8 }
   0x2   :  { %s14_s10 = sshll.u32 %s148_s9, 4  ;;  %s149_s11 = smov 128   ;;  %s15_s10 = int_to_ptr.vmem [resolvable:$true] %s14_s10 }
   0x3   :  { %s150_s12 = smov 8  }
   0x4   :  { %20 = dma.hbm_to_vmem [thread:$0]  %s13_s8, 256, %s15_s10, [#allocation3], %s149_s11, %s149_s11, %s150_s12  }
   0x5   :  { %144 = dma.done.wait [#allocation3], 256  }
   0x6   :  { %145 = vsyncadd [#allocation3], 4294967040  ;;  %v25_v0 = vld [vmem:[#allocation2] sm:$0xff]  ;;  %v26_v1 = vld [vmem:[#allocation2 + $0x8] sm:$0xff]  ;;  %s151_s13 = smov [#allocation5]   ;;  %s75_s17 = sshll.u32 %s175_s1, 4  ;;  %s76_s17 = int_to_ptr.hbm [resolvable:$true] %s75_s17 }
   0x7   :  { %v27_v2 = vand.u32 2147483647, %v25_v0  ;;  %v28_v3 = vand.u32 2147483647, %v26_v1  ;;  %s73_s14 = sshll.u32 %s151_s13, 4  ;;  %s74_s14 = int_to_ptr.vmem [resolvable:$true] %s73_s14 }
   0x9   :  { %v29_v4 = vmax.f32 %v27_v2, %v28_v3 }
   0xb   :  { %30 = vmax.xlane.f32.xlu0 %v29_v4 }
  0x7e   :  { %v31_v5 = vpop.xlane.xlu0 %30 }
  0x7f   :  { %v32_v6 = vrot.slane %v31_v5, 4 }
  0x81   :  { %v33_v7 = vmax.f32 %v31_v5, %v32_v6 }
  0x83   :  { %v34_v8 = vrot.slane %v33_v7, 2 }
  0x85   :  { %v35_v9 = vmax.f32 %v33_v7, %v34_v8 }
  0x87   :  { %v36_v10 = vrot.slane %v35_v9, 1 }
  0x89   :  { %v37_v11 = vmax.f32 %v35_v9, %v36_v10 }
  0x8b   :  { %88 = vpush %v37_v11 }
  0xbc   :  { %s89_s0 = spop %88 }
  0xbd   :  { %v39_v12 = vstv %s89_s0 }
  0xbe   :  { %vm40_vm0 = vcmp.gt.f32.partialorder %v39_v12, 0.0 }
  0xbf   :  { %v41_v13 = vsel %vm40_vm0, %v39_v12, 1.0 }
  0xc0   :  { %94 = vrcp.f32 %v41_v13  ;;  %v53_v17 = vand.u32 2147483648, %v41_v13  ;;  %v51_v19 = vand.u32 2147483647, %v41_v13  ;;  %vm47_vm2 = vweird.f32 %v41_v13 }
  0xc1   :  { %v60_v28 = vmul.f32 0.14285715, %v41_v13 }
  0xc2   :  { %v54_v21 = vor.u32 1.1754944e-38, %v53_v17  ;;  %vm52_vm4 = vcmp.eq.f32.partialorder %v51_v19, 8.507059e+37 }
  0xc6   :  { %v95_v14 = vpop.eup %94 }
  0xc7   :  { %v43_v15 = vmul.f32 %v95_v14, %v41_v13  ;;  %vm48_vm1 = vweird.f32 %v95_v14 }
  0xc8   :  { %vm49_vm3 = vmor %vm47_vm2, %vm48_vm1 }
  0xc9   :  { %v44_v16 = vsub.f32 1.0, %v43_v15 }
  0xcb   :  { %v45_v18 = vmul.f32 %v95_v14, %v44_v16 }
  0xcd   :  { %v46_v20 = vadd.f32 %v95_v14, %v45_v18 }
  0xcf   :  { %v50_v22 = vsel %vm49_vm3, %v95_v14, %v46_v20 }
  0xd0   :  { %v55_v23 = vsel %vm52_vm4, %v54_v21, %v50_v22 }
  0xd1   :  { %v56_v24 = vmul.f32 7.0, %v55_v23 }
  0xd3   :  { %v58_v25 = vand.u32 4286578688, %v56_v24 }
  0xd5   :  { %v61_v26 = vmul.f32 %v58_v25, %v25_v0  ;;  %v62_v27 = vmul.f32 %v58_v25, %v26_v1 }
  0xd7   :  { %v63_v29 = vfloor.f32 %v61_v26  ;;  %v64_v30 = vfloor.f32 %v62_v27 }
  0xd9   :  { %v65_v31 = vmul.f32 %v63_v29, %v60_v28  ;;  %v66_v32 = vmul.f32 %v64_v30, %v60_v28 }
  0xdb   :  { %67 = vst [vmem:[#allocation5] sm:$0xff] %v65_v31 }
  0xdc   :  { %68 = vst [vmem:[#allocation5 + $0x8] sm:$0xff] %v66_v32 }
  0xdd   :  { %81 = dma.vmem_to_hbm [thread:$0]  %s74_s14, 256, %s76_s17, [#allocation4], %s149_s11, %s149_s11, %s150_s12  }
  0xde   :  { %146 = dma.done.wait [#allocation4], 256  }
  0xdf   :  { %147 = vsyncadd [#allocation4], 4294967040 }
  0xe0   :  { %86 = vsyncpa [#allocation3], 1 }
  0xe1   :  { %87 = vsyncpa [#allocation4], 1 }

</bundles_post_ra>
